<compile_context>
chip_gen: v5e
topology: v5e:2x2
jax: 0.10.0
libtpu: 0.0.40
codegen_flags: <defaults>
</compile_context>

<pallas_src>
import functools

import jax
import jax.numpy as jnp
from jax.experimental import pallas as pl
from jax.experimental.pallas import tpu as pltpu

ALPHA = 1000.0
BETA = 10.0

_MIB = 1024 * 1024
_TARGET_BLOCK_BYTES = 4 * _MIB   # per-input block target (2-8 MiB band)
_MIN_ROW_TILE = 128
_LANE = 128


def _round_up(x, m):
    return ((x + m - 1) // m) * m


def _vmem_capacity_bytes():
    try:
        return int(pltpu.get_tpu_info().vmem_capacity_bytes)
    except Exception:
        return 64 * _MIB  # conservative fallback: v7x per-TC capacity


def _vmem_budgets(vmem_cap):
    # Leave headroom for output double-buffers + Mosaic internal scratch:
    # v7x (64 MiB)  -> limit 48 MiB, input budget ~36 MiB
    # v5e/v6e (128) -> limit 112 MiB, input budget ~84 MiB
    vmem_limit = max(32 * _MIB, vmem_cap - 16 * _MIB)
    input_budget = int(0.75 * vmem_limit)  # 2 inputs x 2 pipeline buffers live here
    return vmem_limit, input_budget


def _choose_tiles(r, d, itemsize, input_budget, target_block_bytes):
    """Pick (row_tile, d_tile); working set ~= 4 * row_tile * d_tile * itemsize."""
    max_rows_full_d = input_budget // max(1, 4 * d * itemsize)
    if max_rows_full_d >= _MIN_ROW_TILE:
        # Full feature dim fits: size row_tile so each input block is ~target bytes.
        d_tile = d
        rows_target = max(_MIN_ROW_TILE, target_block_bytes // max(1, d * itemsize))
        row_tile = min(rows_target, max_rows_full_d, _round_up(r, _MIN_ROW_TILE))
        row_tile = max(_MIN_ROW_TILE, (row_tile // _MIN_ROW_TILE) * _MIN_ROW_TILE)
    else:
        # Large D: split the reduction axis, keep the minimum row tile.
        row_tile = _MIN_ROW_TILE
        d_tile = input_budget // max(1, 4 * row_tile * itemsize)
        d_tile = max(_LANE, (d_tile // _LANE) * _LANE)
        d_tile = min(d_tile, _round_up(d, _LANE))
    return row_tile, d_tile


def _mse_bce_kernel(pred_ref, true_ref, out_ref, *, alpha, beta, d_total, d_tile,
                    needs_mask):
    j = pl.program_id(1)  # reduction (D) axis, innermost

    @pl.when(j == 0)
    def _():
        out_ref[...] = jnp.zeros_like(out_ref)

    p = pred_ref[...].astype(jnp.float32)
    t = true_ref[...].astype(jnp.float32)

    if needs_mask:
        lane = jax.lax.broadcasted_iota(jnp.int32, p.shape, 1) + j * d_tile
        valid = lane < d_total
        # Keep masked lanes in BCE's safe domain so no NaN leaks into valid rows.
        p = jnp.where(valid, p, 0.5)
        t = jnp.where(valid, t, 0.5)

    # Fold alpha/D, beta/D into trace-time constants; one fused per-element loss.
    a = alpha / d_total
    b = beta / d_total

    diff = t - p
    # PyTorch F.binary_cross_entropy clamps the log terms at -100.
    log_p = jnp.maximum(jnp.log(p), -100.0)
    log_1mp = jnp.maximum(jnp.log(1.0 - p), -100.0)
    loss_el = a * (diff * diff) - b * (t * (log_p - log_1mp) + log_1mp)
    if needs_mask:
        loss_el = jnp.where(valid, loss_el, 0.0)

    partial = jnp.sum(loss_el, axis=-1, keepdims=True)      # (row_tile, 1)
    out_ref[...] += jnp.transpose(partial)                   # lane-dense (1, row_tile)


def mse_bce_loss(y_pred, y_true, alpha=ALPHA, beta=BETA,
                 _input_budget_bytes=None, _target_block_bytes=None):
    assert y_pred.shape == y_true.shape
    *lead, d = y_pred.shape
    r = 1
    for s in lead:
        r *= s
    pred2d = y_pred.reshape(r, d)
    true2d = y_true.reshape(r, d)

    itemsize = max(jnp.dtype(y_pred.dtype).itemsize, jnp.dtype(y_true.dtype).itemsize)
    vmem_cap = _vmem_capacity_bytes()
    vmem_limit, input_budget = _vmem_budgets(vmem_cap)
    if _input_budget_bytes is not None:            # test hook: force the D-tiled path
        input_budget = _input_budget_bytes
    target = _target_block_bytes if _target_block_bytes is not None else _TARGET_BLOCK_BYTES

    row_tile, d_tile = _choose_tiles(r, d, itemsize, input_budget, target)
    num_row_tiles = pl.cdiv(r, row_tile)
    num_d_tiles = pl.cdiv(d, d_tile)
    needs_mask = (d % d_tile) != 0

    kernel = functools.partial(
        _mse_bce_kernel, alpha=float(alpha), beta=float(beta), d_total=d,
        d_tile=d_tile, needs_mask=needs_mask)

    cost = pl.CostEstimate(
        flops=int(12 * r * d),
        transcendentals=int(2 * r * d),
        bytes_accessed=int(2 * r * d * itemsize + 4 * r),
    )

    out = pl.pallas_call(
        kernel,
        out_shape=jax.ShapeDtypeStruct((1, num_row_tiles * row_tile), jnp.float32),
        grid_spec=pltpu.PrefetchScalarGridSpec(
            num_scalar_prefetch=0,
            grid=(num_row_tiles, num_d_tiles),
            in_specs=[
                pl.BlockSpec((row_tile, d_tile), lambda i, j: (i, j)),
                pl.BlockSpec((row_tile, d_tile), lambda i, j: (i, j)),
            ],
            out_specs=pl.BlockSpec((1, row_tile), lambda i, j: (0, i)),
        ),
        compiler_params=pltpu.CompilerParams(
            dimension_semantics=("parallel", "arbitrary"),
            vmem_limit_bytes=vmem_limit,
        ),
        cost_estimate=cost,
    )(pred2d, true2d)

    # Drop the (unspecified-valued) ragged rows, restore leading dims.
    return out[0, :r].reshape(tuple(lead))


def _reference(y_pred, y_true, alpha=ALPHA, beta=BETA):
    p = y_pred.astype(jnp.float32)
    t = y_true.astype(jnp.float32)
    mse = jnp.mean(jnp.square(t - p), axis=-1)
    log_p = jnp.maximum(jnp.log(p), -100.0)
    log_1mp = jnp.maximum(jnp.log(1.0 - p), -100.0)
    bce = jnp.mean(-(t * log_p + (1.0 - t) * log_1mp), axis=-1)
    return alpha * mse + beta * bce


if __name__ == "__main__":
    key = jax.random.PRNGKey(0)
    k1, k2, k3, k4 = jax.random.split(key, 4)

    # Test 1: common path (full D in one block). batch=2, seq=8, hidden=128.
    shape1 = (2, 8, 128)
    y_pred1 = jax.nn.sigmoid(jax.random.normal(k1, shape1, jnp.float32))
    y_true1 = jax.random.uniform(k2, shape1, jnp.float32, minval=0.0, maxval=1.0)
    out1 = jax.block_until_ready(mse_bce_loss(y_pred1, y_true1))
    ref1 = _reference(y_pred1, y_true1)
    assert out1.shape == ref1.shape == (2, 8)
    assert jnp.allclose(out1, ref1, rtol=2e-5, atol=1e-4), (out1, ref1)

    # Test 2: force the D-tiled accumulator path (ragged rows + ragged D tile)
    # by shrinking the input budget so d_tile < D.
    shape2 = (3, 5, 384)
    y_pred2 = jax.nn.sigmoid(jax.random.normal(k3, shape2, jnp.float32))
    y_true2 = jax.random.uniform(k4, shape2, jnp.float32, minval=0.0, maxval=1.0)
    out2 = jax.block_until_ready(
        mse_bce_loss(y_pred2, y_true2, _input_budget_bytes=512 * 1024))
    ref2 = _reference(y_pred2, y_true2)
    assert out2.shape == ref2.shape == (3, 5)
    assert jnp.allclose(out2, ref2, rtol=2e-5, atol=1e-4), (out2, ref2)

    print("KERNEL_OK")
</pallas_src>

<mosaic_0001>
module attributes {stable_mosaic.version = 11 : i64} {
  func.func @_mse_bce_kernel(%arg0: i32, %arg1: i32, %arg2: memref<128x128xf32, #tpu.memory_space<vmem>>, %arg3: memref<128x128xf32, #tpu.memory_space<vmem>>, %arg4: memref<1x128xf32, #tpu.memory_space<vmem>>) attributes {dimension_semantics = [#tpu.dimension_semantics<parallel>, #tpu.dimension_semantics<arbitrary>], iteration_bounds = array<i64: 1, 1>, scalar_prefetch = 0 : i64, scratch_operands = 0 : i64, tpu.core_type = #tpu.core_type<tc>, window_params = [{transform_indices = @transform_0, window_bounds = array<i64: 128, 128>}, {transform_indices = @transform_1, window_bounds = array<i64: 128, 128>}, {transform_indices = @transform_2, window_bounds = array<i64: 1, 128>}]} {
    %c0_i32 = arith.constant 0 : i32
    %0 = arith.cmpi eq, %arg1, %c0_i32 : i32
    %1 = arith.extui %0 : i1 to i32
    %c0_i32_0 = arith.constant 0 : i32
    %2 = arith.cmpi ne, %1, %c0_i32_0 : i32
    scf.if %2 {
      %cst_13 = arith.constant 0.000000e+00 : f32
      %29 = vector.broadcast %cst_13 : f32 to vector<1x128xf32>
      %c0_14 = arith.constant 0 : index
      %c0_15 = arith.constant 0 : index
      %30 = vector.load %arg4[%c0_14, %c0_15] : memref<1x128xf32, #tpu.memory_space<vmem>>, vector<1x128xf32>
      tpu.vector_store %arg4[%c0_14, %c0_15], %29 {strides = array<i32>} : memref<1x128xf32, #tpu.memory_space<vmem>>, vector<1x128xf32>,
    } else {
    }
    %c0 = arith.constant 0 : index
    %c0_1 = arith.constant 0 : index
    %3 = vector.load %arg2[%c0, %c0_1] : memref<128x128xf32, #tpu.memory_space<vmem>>, vector<128x128xf32>
    %c0_2 = arith.constant 0 : index
    %c0_3 = arith.constant 0 : index
    %4 = vector.load %arg3[%c0_2, %c0_3] : memref<128x128xf32, #tpu.memory_space<vmem>>, vector<128x128xf32>
    %5 = arith.subf %4, %3 : vector<128x128xf32>
    %6 = math.log %3 : vector<128x128xf32>
    %cst = arith.constant -1.000000e+02 : f32
    %7 = vector.broadcast %cst : f32 to vector<128x128xf32>
    %8 = arith.maximumf %6, %7 : vector<128x128xf32>
    %cst_4 = arith.constant 1.000000e+00 : f32
    %9 = vector.broadcast %cst_4 : f32 to vector<128x128xf32>
    %10 = arith.subf %9, %3 : vector<128x128xf32>
    %11 = math.log %10 : vector<128x128xf32>
    %cst_5 = arith.constant -1.000000e+02 : f32
    %12 = vector.broadcast %cst_5 : f32 to vector<128x128xf32>
    %13 = arith.maximumf %11, %12 : vector<128x128xf32>
    %14 = arith.mulf %5, %5 : vector<128x128xf32>
    %cst_6 = arith.constant 7.812500e+00 : f32
    %15 = vector.broadcast %cst_6 : f32 to vector<128x128xf32>
    %16 = arith.mulf %15, %14 : vector<128x128xf32>
    %17 = arith.subf %8, %13 : vector<128x128xf32>
    %18 = arith.mulf %4, %17 : vector<128x128xf32>
    %19 = arith.addf %18, %13 : vector<128x128xf32>
    %cst_7 = arith.constant 7.812500e-02 : f32
    %20 = vector.broadcast %cst_7 : f32 to vector<128x128xf32>
    %21 = arith.mulf %20, %19 : vector<128x128xf32>
    %22 = arith.subf %16, %21 : vector<128x128xf32>
    %cst_8 = arith.constant dense<0.000000e+00> : vector<128xf32>
    %23 = vector.multi_reduction <add>, %22, %cst_8 [1] : vector<128x128xf32> to vector<128xf32>
    %24 = vector.shape_cast %23 : vector<128xf32> to vector<128x1xf32>
    %c0_9 = arith.constant 0 : index
    %c0_10 = arith.constant 0 : index
    %25 = vector.load %arg4[%c0_9, %c0_10] : memref<1x128xf32, #tpu.memory_space<vmem>>, vector<1x128xf32>
    %26 = tpu.transpose %24, [1, 0] : vector<128x1xf32> -> vector<1x128xf32>
    %27 = arith.addf %25, %26 : vector<1x128xf32>
    %c0_11 = arith.constant 0 : index
    %c0_12 = arith.constant 0 : index
    %28 = vector.load %arg4[%c0_11, %c0_12] : memref<1x128xf32, #tpu.memory_space<vmem>>, vector<1x128xf32>
    tpu.vector_store %arg4[%c0_11, %c0_12], %27 {strides = array<i32>} : memref<1x128xf32, #tpu.memory_space<vmem>>, vector<1x128xf32>,
    return
  }
  func.func @transform_0(%arg0: i32, %arg1: i32) -> (i32, i32) {
    %c0_i32 = arith.constant 0 : i32
    return %arg0, %arg1 : i32, i32
  }
  func.func @transform_1(%arg0: i32, %arg1: i32) -> (i32, i32) {
    %c0_i32 = arith.constant 0 : i32
    return %arg0, %arg1 : i32, i32
  }
  func.func @transform_2(%arg0: i32, %arg1: i32) -> (i32, i32) {
    %c0_i32 = arith.constant 0 : i32
    %c0_i32_0 = arith.constant 0 : i32
    return %c0_i32, %arg0 : i32, i32
  }
}

</mosaic_0001>

<bundles_post_ra>
// kernel: tpu_custom_call.1
= control target key start
LH: loop header
LB: loop body
LE: loop exit
PB: predicated region body
PF: predicated region fallthrough
CT: control target
= control target key end

     0   :  { %7 = vsyncpa [#allocation3], 0  ;;  %s645_s0 = inlined_call_operand.hbm [shape: f32[16,128], index: 0, kind: input, shape index: {}]   ;;  %s646_s1 = inlined_call_operand.hbm [shape: f32[16,128], index: 1, kind: input, shape index: {}]   ;;  %s647_s2 = inlined_call_operand.hbm [shape: f32[1,128], index: 2, kind: output, shape index: {}]  }
   0x1   :  { %8 = vsyncpa [#allocation6], 0 }
   0x2   :  { %9 = vsyncpa [#allocation4], 0 }
   0x3   :  { %13 = vsyncadd [#allocation3], 1792  ;;  %s14_s11 = sshll.u32 %s645_s0, 4  ;;  %s554_s12 = smov [#allocation2]   ;;  %s15_s11 = int_to_ptr.hbm [resolvable:$true] %s14_s11 }
   0x4   :  { %s16_s13 = sshll.u32 %s554_s12, 4  ;;  %s555_s14 = smov 128   ;;  %s17_s13 = int_to_ptr.vmem [resolvable:$true] %s16_s13 }
   0x5   :  { %s556_s15 = smov 8  }
   0x6   :  { %22 = dma.hbm_to_vmem [thread:$0]  %s15_s11, 256, %s17_s13, [#allocation3], %s555_s14, %s555_s14, %s556_s15  }
   0x7   :  { %26 = vsyncadd [#allocation6], 1792  ;;  %s27_s18 = sshll.u32 %s646_s1, 4  ;;  %s557_s19 = smov [#allocation5]   ;;  %s28_s18 = int_to_ptr.hbm [resolvable:$true] %s27_s18 }
   0x8   :  { %s29_s20 = sshll.u32 %s557_s19, 4  ;;  %s30_s20 = int_to_ptr.vmem [resolvable:$true] %s29_s20 }
   0x9   :  { %35 = dma.hbm_to_vmem [thread:$0]  %s28_s18, 256, %s30_s20, [#allocation6], %s555_s14, %s555_s14, %s556_s15  }
   0xa   :  { %548 = dma.done.wait [#allocation3], 2048  }
   0xb   :  { %549 = vsyncadd [#allocation3], 4294965248 }
   0xc   :  { %550 = dma.done.wait [#allocation6], 2048  }
   0xd   :  { %551 = vsyncadd [#allocation6], 4294965248  ;;  %v49_v0 = vld [vmem:[#allocation2] sm:$0xff]  ;;  %v50_v2 = vld [vmem:[#allocation2 + $0x8] sm:$0xff]  ;;  %s559_s0 = smov [#allocation7]   ;;  %s395_s23 = sshll.u32 %s647_s2, 4  ;;  %s396_s23 = int_to_ptr.hbm [resolvable:$true] %s395_s23 }
   0xe   :  { %v581_v1 = vld [vmem:[#allocation5] sm:$0xff]  ;;  %412 = vlog2.f32 %v49_v0  ;;  %v145_v4 = vsub.f32 1.0, %v49_v0  ;;  %v584_v5 = vld [vmem:[#allocation5 + $0x8] sm:$0xff]  ;;  %v146_v6 = vsub.f32 1.0, %v50_v2  ;;  %v51_v7 = vld [vmem:[#allocation2 + $0x10] sm:$0xff]  ;;  %s393_s1 = sshll.u32 %s559_s0, 4  ;;  %s394_s1 = int_to_ptr.vmem [resolvable:$true] %s393_s1 }
   0xf   :  { %v81_v3 = vsub.f32 %v581_v1, %v49_v0  ;;  %v586_v8 = vld [vmem:[#allocation5 + $0x10] sm:$0xff]  ;;  %v82_v9 = vsub.f32 %v584_v5, %v50_v2  ;;  %414 = vlog2.f32 %v50_v2  ;;  %v147_v11 = vsub.f32 1.0, %v51_v7  ;;  %v52_v12 = vld [vmem:[#allocation2 + $0x18] sm:$0xff]  ;;  %v53_v16 = vld [vmem:[#allocation2 + $0x20] sm:$0xff] }
  0x10   :  { %v83_v10 = vsub.f32 %v586_v8, %v51_v7  ;;  %v590_v13 = vld [vmem:[#allocation5 + $0x18] sm:$0xff]  ;;  %416 = vlog2.f32 %v145_v4  ;;  %v593_v17 = vld [vmem:[#allocation5 + $0x20] sm:$0xff]  ;;  %v148_v19 = vsub.f32 1.0, %v52_v12  ;;  %v54_v22 = vld [vmem:[#allocation2 + $0x28] sm:$0xff]  ;;  %v149_v23 = vsub.f32 1.0, %v53_v16 }
  0x11   :  { %v209_v14 = vmul.f32 %v81_v3, %v81_v3  ;;  %v84_v15 = vsub.f32 %v590_v13, %v52_v12  ;;  %418 = vlog2.f32 %v146_v6  ;;  %v210_v18 = vmul.f32 %v82_v9, %v82_v9  ;;  %v598_v27 = vld [vmem:[#allocation2 + $0x38] sm:$0xff]  ;;  %v604_v36 = vld [vmem:[#allocation5 + $0x28] sm:$0xff]  ;;  %v55_v53 = vld [vmem:[#allocation2 + $0x30] sm:$0xff] }
  0x12   :  { %420 = vlog2.f32 %v51_v7  ;;  %v211_v20 = vmul.f32 %v83_v10, %v83_v10  ;;  %v85_v21 = vsub.f32 %v593_v17, %v53_v16  ;;  %v150_v31 = vsub.f32 1.0, %v54_v22 }
  0x13   :  { %422 = vlog2.f32 %v147_v11  ;;  %v596_v25 = vmul.f32 7.8125, %v209_v14  ;;  %v212_v26 = vmul.f32 %v84_v15, %v84_v15  ;;  %v600_v30 = vmul.f32 7.8125, %v210_v18 }
  0x14   :  { %v413_v24 = vpop.eup %412  ;;  %424 = vlog2.f32 %v52_v12  ;;  %v602_v34 = vmul.f32 7.8125, %v211_v20  ;;  %v213_v35 = vmul.f32 %v85_v21, %v85_v21  ;;  %v152_v40 = vsub.f32 1.0, %v598_v27 }
  0x15   :  { %v415_v28 = vpop.eup %414  ;;  %v98_v29 = vmul.f32 0.6931472, %v413_v24  ;;  %426 = vlog2.f32 %v148_v19  ;;  %v607_v44 = vmul.f32 7.8125, %v212_v26  ;;  %v86_v48 = vsub.f32 %v604_v36, %v54_v22 }
  0x16   :  { %v417_v32 = vpop.eup %416  ;;  %v100_v33 = vmul.f32 0.6931472, %v415_v28  ;;  %428 = vlog2.f32 %v53_v16  ;;  %v610_v52 = vmul.f32 7.8125, %v213_v35  ;;  %v151_v3 = vsub.f32 1.0, %v55_v53  ;;  %v72_v16 = vld [vmem:[#allocation5 + $0x38] sm:$0xff] }
  0x17   :  { %v419_v37 = vpop.eup %418  ;;  %v129_v38 = vmax.f32 %v98_v29, -100.0  ;;  %v162_v39 = vmul.f32 0.6931472, %v417_v32  ;;  %430 = vlog2.f32 %v149_v23 }
  0x18   :  { %v421_v41 = vpop.eup %420  ;;  %v130_v42 = vmax.f32 %v100_v33, -100.0  ;;  %v164_v43 = vmul.f32 0.6931472, %v419_v37  ;;  %432 = vlog2.f32 %v54_v22  ;;  %v88_v33 = vsub.f32 %v72_v16, %v598_v27 }
  0x19   :  { %v423_v45 = vpop.eup %422  ;;  %v193_v46 = vmax.f32 %v162_v39, -100.0  ;;  %v102_v47 = vmul.f32 0.6931472, %v421_v41  ;;  %434 = vlog2.f32 %v150_v31 }
  0x1a   :  { %v425_v49 = vpop.eup %424  ;;  %v194_v50 = vmax.f32 %v164_v43, -100.0  ;;  %v166_v51 = vmul.f32 0.6931472, %v423_v45  ;;  %436 = vlog2.f32 %v598_v27 }
  0x1b   :  { %v427_v54 = vpop.eup %426  ;;  %v241_v55 = vsub.f32 %v129_v38, %v193_v46  ;;  %v131_v56 = vmax.f32 %v102_v47, -100.0  ;;  %v104_v57 = vmul.f32 0.6931472, %v425_v49  ;;  %438 = vlog2.f32 %v152_v40 }
  0x1c   :  { %v429_v58 = vpop.eup %428  ;;  %v242_v59 = vsub.f32 %v130_v42, %v194_v50  ;;  %v195_v60 = vmax.f32 %v166_v51, -100.0  ;;  %v168_v61 = vmul.f32 0.6931472, %v427_v54  ;;  %440 = vlog2.f32 %v55_v53  ;;  %v59_v54 = vld [vmem:[#allocation2 + $0x50] sm:$0xff] }
  0x1d   :  { %v431_v62 = vpop.eup %430  ;;  %v257_v63 = vmul.f32 %v241_v55, %v581_v1  ;;  %v132_v0 = vmax.f32 %v104_v57, -100.0  ;;  %v106_v2 = vmul.f32 0.6931472, %v429_v58  ;;  %442 = vlog2.f32 %v151_v3 }
  0x1e   :  { %v433_v4 = vpop.eup %432  ;;  %v258_v6 = vmul.f32 %v242_v59, %v584_v5  ;;  %v243_v7 = vsub.f32 %v131_v56, %v195_v60  ;;  %v196_v9 = vmax.f32 %v168_v61, -100.0  ;;  %v170_v10 = vmul.f32 0.6931472, %v431_v62  ;;  %v62_v61 = vld [vmem:[#allocation2 + $0x68] sm:$0xff] }
  0x1f   :  { %v435_v11 = vpop.eup %434  ;;  %v273_v12 = vadd.f32 %v257_v63, %v193_v46  ;;  %v133_v14 = vmax.f32 %v106_v2, -100.0  ;;  %v108_v15 = vmul.f32 0.6931472, %v433_v4  ;;  %v214_v46 = vmul.f32 %v86_v48, %v86_v48 }
  0x20   :  { %v437_v18 = vpop.eup %436  ;;  %v274_v19 = vadd.f32 %v258_v6, %v194_v50  ;;  %v259_v20 = vmul.f32 %v243_v7, %v586_v8  ;;  %v244_v1 = vsub.f32 %v132_v0, %v196_v9  ;;  %v197_v21 = vmax.f32 %v170_v10, -100.0  ;;  %v71_v8 = vld [vmem:[#allocation5 + $0x30] sm:$0xff]  ;;  %v57_v7 = vld [vmem:[#allocation2 + $0x40] sm:$0xff] }
  0x21   :  { %v439_v22 = vpop.eup %438  ;;  %v289_v23 = vmul.f32 0.078125, %v273_v12  ;;  %v134_v24 = vmax.f32 %v108_v15, -100.0  ;;  %v172_v26 = vmul.f32 0.6931472, %v435_v11  ;;  %v112_v5 = vmul.f32 0.6931472, %v437_v18 }
  0x22   :  { %v441_v28 = vpop.eup %440  ;;  %v275_v29 = vadd.f32 %v259_v20, %v195_v60  ;;  %v260_v31 = vmul.f32 %v244_v1, %v590_v13  ;;  %v245_v32 = vsub.f32 %v133_v14, %v197_v21  ;;  %v176_v39 = vmul.f32 0.6931472, %v439_v22  ;;  %v78_v1 = vld [vmem:[#allocation5 + $0x68] sm:$0xff]  ;;  %v628_v22 = vld [vmem:[#allocation5 + $0x40] sm:$0xff] }
  0x23   :  { %v305_v35 = vsub.f32 %v596_v25, %v289_v23  ;;  %v198_v37 = vmax.f32 %v172_v26, -100.0  ;;  %v136_v38 = vmax.f32 %v112_v5, -100.0  ;;  %v290_v40 = vmul.f32 0.078125, %v274_v19  ;;  %v443_v45 = vpop.eup %442 }
  0x24   :  { %v291_v41 = vmul.f32 0.078125, %v275_v29  ;;  %v276_v42 = vadd.f32 %v260_v31, %v196_v9  ;;  %v261_v43 = vmul.f32 %v245_v32, %v593_v17  ;;  %v200_v49 = vmax.f32 %v176_v39, -100.0 }
  0x25   :  { %321 = vadd.xlane.f32.xlu0 %v305_v35  ;;  %v246_v47 = vsub.f32 %v134_v24, %v198_v37  ;;  %v110_v13 = vmul.f32 0.6931472, %v441_v28  ;;  %v87_v51 = vsub.f32 %v71_v8, %v55_v53  ;;  %v174_v25 = vmul.f32 0.6931472, %v443_v45  ;;  %v630_v24 = vld [vmem:[#allocation2 + $0x58] sm:$0xff] }
  0x26   :  { %v307_v50 = vsub.f32 %v602_v34, %v291_v41  ;;  %v277_v27 = vadd.f32 %v261_v43, %v197_v21  ;;  %v216_v56 = vmul.f32 %v88_v33, %v88_v33  ;;  %v248_v57 = vsub.f32 %v136_v38, %v200_v49  ;;  %v633_v33 = vld [vmem:[#allocation5 + $0x48] sm:$0xff] }
  0x27   :  { %v262_v55 = vmul.f32 %v246_v47, %v604_v36  ;;  %v135_v58 = vmax.f32 %v110_v13, -100.0  ;;  %v306_v59 = vsub.f32 %v600_v30, %v290_v40  ;;  %v292_v17 = vmul.f32 0.078125, %v276_v42  ;;  %v624_v36 = vld [vmem:[#allocation5 + $0x50] sm:$0xff]  ;;  %v61_v40 = vld [vmem:[#allocation2 + $0x60] sm:$0xff] }
  0x28   :  { %325 = vadd.xlane.f32.xlu1 %v307_v50  ;;  %v293_v60 = vmul.f32 0.078125, %v277_v27  ;;  %v199_v48 = vmax.f32 %v174_v25, -100.0  ;;  %v264_v63 = vmul.f32 %v248_v57, %v72_v16  ;;  %444 = vlog2.f32 %v59_v54 }
  0x29   :  { %v278_v62 = vadd.f32 %v262_v55, %v198_v37  ;;  %v155_v34 = vsub.f32 1.0, %v59_v54  ;;  %v230_v0 = vmul.f32 7.8125, %v214_v46  ;;  %v215_v2 = vmul.f32 %v87_v51, %v87_v51 }
  0x2a   :  { %v309_v53 = vsub.f32 %v610_v52, %v293_v60  ;;  %v247_v3 = vsub.f32 %v135_v58, %v199_v48  ;;  %v280_v6 = vadd.f32 %v264_v63, %v200_v49  ;;  %v158_v30 = vsub.f32 1.0, %v62_v61  ;;  %v58_v52 = vld [vmem:[#allocation2 + $0x48] sm:$0xff]  ;;  %v63_v63 = vld [vmem:[#allocation2 + $0x70] sm:$0xff] }
  0x2b   :  { %v294_v4 = vmul.f32 0.078125, %v278_v62  ;;  %446 = vlog2.f32 %v155_v34  ;;  %v308_v9 = vsub.f32 %v607_v44, %v292_v17  ;;  %v91_v11 = vsub.f32 %v624_v36, %v59_v54 }
  0x2c   :  { %329 = vadd.xlane.f32.xlu2 %v309_v53  ;;  %v263_v10 = vmul.f32 %v247_v3, %v71_v8  ;;  %448 = vlog2.f32 %v62_v61  ;;  %v231_v12 = vmul.f32 7.8125, %v215_v2  ;;  %v153_v15 = vsub.f32 1.0, %v57_v7 }
  0x2d   :  { %323 = vadd.xlane.f32.xlu0 %v306_v59  ;;  %450 = vlog2.f32 %v158_v30  ;;  %v310_v18 = vsub.f32 %v230_v0, %v294_v4  ;;  %v232_v19 = vmul.f32 7.8125, %v216_v56  ;;  %v296_v20 = vmul.f32 0.078125, %v280_v6  ;;  %v76_v30 = vld [vmem:[#allocation5 + $0x58] sm:$0xff] }
  0x2e   :  { %v279_v14 = vadd.f32 %v263_v10, %v199_v48  ;;  %452 = vlog2.f32 %v57_v7  ;;  %v445_v16 = vpop.eup %444  ;;  %v154_v23 = vsub.f32 1.0, %v58_v52  ;;  %v219_v5 = vmul.f32 %v91_v11, %v91_v11 }
  0x2f   :  { %454 = vlog2.f32 %v58_v52  ;;  %v118_v21 = vmul.f32 0.6931472, %v445_v16  ;;  %v94_v37 = vsub.f32 %v78_v1, %v62_v61  ;;  %v89_v39 = vsub.f32 %v628_v22, %v57_v7 }
  0x30   :  { %327 = vadd.xlane.f32.xlu1 %v308_v9  ;;  %v295_v44 = vmul.f32 0.078125, %v279_v14  ;;  %456 = vlog2.f32 %v153_v15  ;;  %v156_v8 = vsub.f32 1.0, %v630_v24  ;;  %v312_v42 = vsub.f32 %v232_v19, %v296_v20  ;;  %v77_v15 = vld [vmem:[#allocation5 + $0x60] sm:$0xff] }
  0x31   :  { %v447_v26 = vpop.eup %446  ;;  %458 = vlog2.f32 %v630_v24  ;;  %v139_v31 = vmax.f32 %v118_v21, -100.0  ;;  %v90_v13 = vsub.f32 %v633_v33, %v58_v52  ;;  %v157_v54 = vsub.f32 1.0, %v61_v40 }
  0x32   :  { %v449_v28 = vpop.eup %448  ;;  %v311_v29 = vsub.f32 %v231_v12, %v295_v44  ;;  %v182_v32 = vmul.f32 0.6931472, %v447_v26  ;;  %460 = vlog2.f32 %v154_v23  ;;  %v235_v56 = vmul.f32 7.8125, %v219_v5 }
  0x33   :  { %v451_v35 = vpop.eup %450  ;;  %v124_v38 = vmul.f32 0.6931472, %v449_v28  ;;  %462 = vlog2.f32 %v61_v40  ;;  %v222_v57 = vmul.f32 %v94_v37, %v94_v37  ;;  %v217_v61 = vmul.f32 %v89_v39, %v89_v39 }
  0x34   :  { %v453_v41 = vpop.eup %452  ;;  %331 = vadd.xlane.f32.xlu2 %v310_v18  ;;  %v203_v43 = vmax.f32 %v182_v32, -100.0  ;;  %v188_v45 = vmul.f32 0.6931472, %v451_v35  ;;  %464 = vlog2.f32 %v156_v8  ;;  %v218_v6 = vmul.f32 %v90_v13, %v90_v13 }
  0x35   :  { %v455_v46 = vpop.eup %454  ;;  %333 = vadd.xlane.f32.xlu0 %v311_v29  ;;  %v142_v47 = vmax.f32 %v124_v38, -100.0  ;;  %v114_v49 = vmul.f32 0.6931472, %v453_v41  ;;  %466 = vlog2.f32 %v157_v54  ;;  %v159_v52 = vsub.f32 1.0, %v63_v63 }
  0x36   :  { %v457_v50 = vpop.eup %456  ;;  %v251_v27 = vsub.f32 %v139_v31, %v203_v43  ;;  %v206_v51 = vmax.f32 %v188_v45, -100.0  ;;  %v116_v25 = vmul.f32 0.6931472, %v455_v46  ;;  %468 = vlog2.f32 %v63_v63  ;;  %v79_v45 = vld [vmem:[#allocation5 + $0x70] sm:$0xff] }
  0x37   :  { %v459_v55 = vpop.eup %458  ;;  %v137_v58 = vmax.f32 %v114_v49, -100.0  ;;  %v178_v59 = vmul.f32 0.6931472, %v457_v50  ;;  %v92_v20 = vsub.f32 %v76_v30, %v630_v24  ;;  %470 = vlog2.f32 %v159_v52 }
  0x38   :  { %v461_v17 = vpop.eup %460  ;;  %335 = vadd.xlane.f32.xlu1 %v312_v42  ;;  %v267_v60 = vmul.f32 %v251_v27, %v624_v36  ;;  %v254_v48 = vsub.f32 %v142_v47, %v206_v51  ;;  %v120_v62 = vmul.f32 0.6931472, %v459_v55  ;;  %v138_v53 = vmax.f32 %v116_v25, -100.0 }
  0x39   :  { %v201_v34 = vmax.f32 %v178_v59, -100.0  ;;  %v180_v0 = vmul.f32 0.6931472, %v461_v17  ;;  %v463_v2 = vpop.eup %462  ;;  %v238_v44 = vmul.f32 7.8125, %v222_v57  ;;  %v233_v21 = vmul.f32 7.8125, %v217_v61 }
  0x3a   :  { %v283_v3 = vadd.f32 %v267_v60, %v203_v43  ;;  %v270_v4 = vmul.f32 %v254_v48, %v78_v1  ;;  %v465_v7 = vpop.eup %464  ;;  %v140_v11 = vmax.f32 %v120_v62, -100.0  ;;  %v122_v16 = vmul.f32 0.6931472, %v463_v2 }
  0x3b   :  { %v249_v9 = vsub.f32 %v137_v58, %v201_v34  ;;  %v202_v10 = vmax.f32 %v180_v0, -100.0  ;;  %v184_v14 = vmul.f32 0.6931472, %v465_v7  ;;  %v467_v26 = vpop.eup %466  ;;  %v93_v31 = vsub.f32 %v77_v15, %v61_v40 }
  0x3c   :  { %v299_v36 = vmul.f32 0.078125, %v283_v3  ;;  %v286_v12 = vadd.f32 %v270_v4, %v206_v51  ;;  %v469_v32 = vpop.eup %468  ;;  %v234_v35 = vmul.f32 7.8125, %v218_v6  ;;  %v141_v38 = vmax.f32 %v122_v16, -100.0 }
  0x3d   :  { %v265_v18 = vmul.f32 %v249_v9, %v628_v22  ;;  %v250_v19 = vsub.f32 %v138_v53, %v202_v10  ;;  %v204_v23 = vmax.f32 %v184_v14, -100.0  ;;  %v186_v22 = vmul.f32 0.6931472, %v467_v26  ;;  %v471_v46 = vpop.eup %470 }
  0x3e   :  { %v315_v1 = vsub.f32 %v235_v56, %v299_v36  ;;  %v302_v5 = vmul.f32 0.078125, %v286_v12  ;;  %v220_v24 = vmul.f32 %v92_v20, %v92_v20  ;;  %v126_v41 = vmul.f32 0.6931472, %v469_v32  ;;  %v80_v36 = vld [vmem:[#allocation5 + $0x78] sm:$0xff] }
  0x3f   :  { %v281_v28 = vadd.f32 %v265_v18, %v201_v34  ;;  %v266_v29 = vmul.f32 %v250_v19, %v633_v33  ;;  %v252_v37 = vsub.f32 %v140_v11, %v204_v23  ;;  %v205_v43 = vmax.f32 %v186_v22, -100.0 }
  0x40   :  { %341 = vadd.xlane.f32.xlu1 %v315_v1  ;;  %v318_v47 = vsub.f32 %v238_v44, %v302_v5  ;;  %v221_v50 = vmul.f32 %v93_v31, %v93_v31  ;;  %v143_v27 = vmax.f32 %v126_v41, -100.0  ;;  %v190_v51 = vmul.f32 0.6931472, %v471_v46 }
  0x41   :  { %v297_v39 = vmul.f32 0.078125, %v281_v28  ;;  %v282_v8 = vadd.f32 %v266_v29, %v202_v10  ;;  %v268_v42 = vmul.f32 %v252_v37, %v76_v30  ;;  %v253_v40 = vsub.f32 %v141_v38, %v205_v43 }
  0x42   :  { %v236_v54 = vmul.f32 7.8125, %v220_v24  ;;  %v95_v55 = vsub.f32 %v79_v45, %v63_v63  ;;  %v207_v58 = vmax.f32 %v190_v51, -100.0  ;;  %v237_v59 = vmul.f32 7.8125, %v221_v50  ;;  %v64_v63 = vld [vmem:[#allocation2 + $0x78] sm:$0xff] }
  0x43   :  { %v313_v49 = vsub.f32 %v233_v21, %v297_v39  ;;  %v298_v13 = vmul.f32 0.078125, %v282_v8  ;;  %v284_v33 = vadd.f32 %v268_v42, %v204_v23  ;;  %v269_v57 = vmul.f32 %v253_v40, %v77_v15 }
  0x44   :  { %v255_v60 = vsub.f32 %v143_v27, %v207_v58  ;;  %v223_v61 = vmul.f32 %v95_v55, %v95_v55  ;;  %v160_v6 = vsub.f32 1.0, %v64_v63  ;;  %472 = vlog2.f32 %v64_v63 }
  0x45   :  { %337 = vadd.xlane.f32.xlu2 %v313_v49  ;;  %v314_v25 = vsub.f32 %v234_v35, %v298_v13  ;;  %v300_v56 = vmul.f32 0.078125, %v284_v33  ;;  %v285_v17 = vadd.f32 %v269_v57, %v205_v43  ;;  %v96_v14 = vsub.f32 %v80_v36, %v64_v63 }
  0x46   :  { %v271_v34 = vmul.f32 %v255_v60, %v79_v45  ;;  %v239_v2 = vmul.f32 7.8125, %v223_v61  ;;  %474 = vlog2.f32 %v160_v6  ;;  %v558_v22 = vmov 0.0  }
  0x47   :  { %339 = vadd.xlane.f32.xlu0 %v314_v25  ;;  %v316_v48 = vsub.f32 %v236_v54, %v300_v56  ;;  %v301_v62 = vmul.f32 0.078125, %v285_v17  ;;  %v224_v16 = vmul.f32 %v96_v14, %v96_v14  ;;  %48 = vst [vmem:[#allocation7] sm:$0x1] %v558_v22 }
  0x48   :  { %347 = vadd.xlane.f32.xlu1 %v318_v47  ;;  %v287_v0 = vadd.f32 %v271_v34, %v207_v58 }
  0x49   :  { %v317_v53 = vsub.f32 %v237_v59, %v301_v62  ;;  %v240_v19 = vmul.f32 7.8125, %v224_v16 }
  0x4a   :  { %v303_v3 = vmul.f32 0.078125, %v287_v0  ;;  %v473_v30 = vpop.eup %472 }
  0x4b   :  { %v128_v9 = vmul.f32 0.6931472, %v473_v30 }
  0x4c   :  { %v319_v4 = vsub.f32 %v239_v2, %v303_v3  ;;  %v475_v7 = vpop.eup %474 }
  0x4d   :  { %343 = vadd.xlane.f32.xlu2 %v316_v48  ;;  %v192_v10 = vmul.f32 0.6931472, %v475_v7  ;;  %v144_v11 = vmax.f32 %v128_v9, -100.0 }
  0x4e   :  { %v353_v42 = vld [vmem:[#allocation7] sm:$0x1] }
  0x4f   :  { %345 = vadd.xlane.f32.xlu0 %v317_v53  ;;  %v208_v52 = vmax.f32 %v192_v10, -100.0 }
  0x51   :  { %v256_v12 = vsub.f32 %v144_v11, %v208_v52 }
  0x53   :  { %v272_v15 = vmul.f32 %v256_v12, %v80_v36 }
  0x55   :  { %349 = vadd.xlane.f32.xlu2 %v319_v4  ;;  %v288_v18 = vadd.f32 %v272_v15, %v208_v52 }
  0x57   :  { %v304_v20 = vmul.f32 0.078125, %v288_v18 }
  0x59   :  { %v320_v1 = vsub.f32 %v240_v19, %v304_v20 }
  0x5b   :  { %351 = vadd.xlane.f32.xlu0 %v320_v1 }
  0x98   :  { %v322_v44 = vpop.xlane.xlu0 %321 }
  0x99   :  { %354 = vxpose.xlu1.b32.start [1/16] (narrow) %v322_v44, 8 }
  0x9b   :  { %v326_v23 = vpop.xlane.xlu1 %325 }
  0x9f   :  { %v330_v5 = vpop.xlane.xlu2 %329 }
  0xa0   :  { %v324_v21 = vpop.xlane.xlu0 %323 }
  0xa1   :  { %355 = vxpose.xlu1.b32.cont [2/16] (narrow) %v324_v21, 8 }
  0xa3   :  { %v328_v26 = vpop.xlane.xlu1 %327 }
  0xa7   :  { %v332_v28 = vpop.xlane.xlu2 %331 }
  0xa8   :  { %v334_v29 = vpop.xlane.xlu0 %333 }
  0xa9   :  { %356 = vxpose.xlu1.b32.cont [3/16] (narrow) %v326_v23, 8 }
  0xab   :  { %v336_v31 = vpop.xlane.xlu1 %335 }
  0xb1   :  { %357 = vxpose.xlu1.b32.cont [4/16] (narrow) %v328_v26, 8 }
  0xb3   :  { %v342_v37 = vpop.xlane.xlu1 %341 }
  0xb8   :  { %v338_v32 = vpop.xlane.xlu2 %337 }
  0xb9   :  { %358 = vxpose.xlu1.b32.cont [5/16] (narrow) %v330_v5, 8 }
  0xba   :  { %v340_v35 = vpop.xlane.xlu0 %339 }
  0xbb   :  { %v348_v8 = vpop.xlane.xlu1 %347 }
  0xc0   :  { %v344_v38 = vpop.xlane.xlu2 %343 }
  0xc1   :  { %359 = vxpose.xlu1.b32.cont [6/16] (narrow) %v332_v28, 8 }
  0xc2   :  { %v346_v39 = vpop.xlane.xlu0 %345 }
  0xc8   :  { %v350_v24 = vpop.xlane.xlu2 %349 }
  0xc9   :  { %360 = vxpose.xlu1.b32.cont [7/16] (narrow) %v334_v29, 8 }
  0xce   :  { %v352_v41 = vpop.xlane.xlu0 %351 }
  0xd1   :  { %361 = vxpose.xlu1.b32.cont [8/16] (narrow) %v336_v31, 8 }
  0xd9   :  { %362 = vxpose.xlu1.b32.cont [9/16] (narrow) %v338_v32, 8 }
  0xe1   :  { %363 = vxpose.xlu1.b32.cont [10/16] (narrow) %v340_v35, 8 }
  0xe9   :  { %364 = vxpose.xlu1.b32.cont [11/16] (narrow) %v342_v37, 8 }
  0xf1   :  { %365 = vxpose.xlu1.b32.cont [12/16] (narrow) %v344_v38, 8 }
  0xf9   :  { %366 = vxpose.xlu1.b32.cont [13/16] (narrow) %v346_v39, 8 }
 0x101   :  { %367 = vxpose.xlu1.b32.cont [14/16] (narrow) %v348_v8, 8 }
 0x109   :  { %368 = vxpose.xlu1.b32.cont [15/16] (narrow) %v350_v24, 8 }
 0x111   :  { %369 = vxpose.xlu1.b32.end [16/16] (narrow) %v352_v41, 8 }
 0x13d   :  { %v370_v43 = vpop.trf.xlu1 }
 0x13e   :  { %v386_v45 = vadd.f32 %v370_v43, %v353_v42 }
 0x140   :  { %387 = vst [vmem:[#allocation7] sm:$0x1] %v386_v45 }
 0x141   :  { %398 = dma.vmem_to_hbm [thread:$0]  %s394_s1, 16, %s396_s23, [#allocation4]  }
 0x142   :  { %552 = dma.done.wait [#allocation4], 16  }
 0x143   :  { %553 = vsyncadd [#allocation4], 4294967280 }
 0x144   :  { %403 = vsyncpa [#allocation3], 1 }
 0x145   :  { %404 = vsyncpa [#allocation6], 1 }
 0x146   :  { %405 = vsyncpa [#allocation4], 1 }

</bundles_post_ra>
